<compile_context>
chip_gen: v5e
topology: v5e:2x2
jax: 0.10.0
libtpu: 0.0.40
codegen_flags: <defaults>
</compile_context>

<pallas_src>
import math
import numpy as np
import jax
import jax.numpy as jnp
from jax.experimental import pallas as pl
from jax.experimental.pallas import tpu as pltpu


# ------------------------------ hardware budget ------------------------------

def _physical_vmem_bytes():
    try:
        info = pltpu.get_tpu_info()
        cap = getattr(info, "vmem_capacity_bytes", None)
        if cap:
            return int(cap)
    except Exception:
        pass
    return 64 * 1024 * 1024          # conservative fallback (v7x-sized VMEM)


_VMEM_PHYS = _physical_vmem_bytes()
_VMEM_LIMIT = (_VMEM_PHYS * 3) // 4  # ~96 MiB on v5e/v6e, ~48 MiB on v7x
_TM_MAX = 512 if _VMEM_PHYS >= 128 * 1024 * 1024 else 256


# ------------------------------- tiling helpers ------------------------------

def _round_up(x, m):
    return ((x + m - 1) // m) * m


def _pad_dim(x):
    """Lane-facing dims: 128 if tiny, otherwise a multiple of 256 (full MXU cols)."""
    x = max(int(x), 1)
    return 128 if x <= 128 else _round_up(x, 256)


def _pick_tile(dim_pad, candidates=(512, 256, 128)):
    """Largest aligned tile that divides the (already padded) dim."""
    for c in candidates:
        if dim_pad % c == 0:
            return c
    return dim_pad


def _batch_tiling(n, tm_max=_TM_MAX):
    """(padded rows, row tile).  Small batches -> single 16-aligned block;
    large batches pick the tile (<= tm_max) minimizing dead-row padding,
    preferring larger tiles (less weight re-streaming) on ties."""
    n = int(n)
    n_pad = _round_up(max(n, 16), 16)
    if n_pad <= 256:
        return n_pad, n_pad
    tiles = [t for t in (512, 256, 128) if t <= tm_max]
    tm = min(tiles, key=lambda t: (_round_up(n, t), -t))
    return _round_up(n, tm), tm


# --------------------------------- kernel ------------------------------------

def _linear_kernel(x_ref, w_ref, b_ref, o_ref):
    """o = x @ W + b, tiled over grid (M, N, K).

    The f32 output block is revisited across the K axis and used directly as
    the accumulator: initialized with the broadcast bias at k == 0, accumulated
    in place afterwards (no scratch, no finalize copy)."""
    @pl.when(pl.program_id(2) == 0)
    def _init():
        o_ref[...] = jnp.broadcast_to(b_ref[...], o_ref.shape)

    o_ref[...] += jnp.dot(x_ref[...], w_ref[...],
                          preferred_element_type=jnp.float32)


def linear(x, w, b, *, tm, tn, tk):
    """x: (N_pad, D_pad) bf16, w: (D_pad, O_pad) bf16, b: (1, O_pad) f32 -> f32."""
    n_pad, d_pad = x.shape
    o_pad = w.shape[1]
    grid = (n_pad // tm, o_pad // tn, d_pad // tk)
    flops = 2 * n_pad * d_pad * o_pad
    bytes_accessed = x.size * 2 + w.size * 2 + b.size * 4 + n_pad * o_pad * 4
    # TODO(synk): if profiling on v5e shows exposed weight DMA, add
    # pipeline_mode=pl.Buffered(3) to the W BlockSpec below.
    return pl.pallas_call(
        _linear_kernel,
        out_shape=jax.ShapeDtypeStruct((n_pad, o_pad), jnp.float32),
        grid_spec=pltpu.PrefetchScalarGridSpec(
            num_scalar_prefetch=0,
            grid=grid,
            in_specs=[
                pl.BlockSpec((tm, tk), lambda i, j, k: (i, k)),
                pl.BlockSpec((tk, tn), lambda i, j, k: (k, j)),
                pl.BlockSpec((1, tn), lambda i, j, k: (0, j)),
            ],
            out_specs=pl.BlockSpec((tm, tn), lambda i, j, k: (i, j)),
        ),
        compiler_params=pltpu.CompilerParams(
            dimension_semantics=("parallel", "parallel", "arbitrary"),
            vmem_limit_bytes=int(_VMEM_LIMIT),
        ),
        cost_estimate=pl.CostEstimate(
            flops=flops, transcendentals=0, bytes_accessed=bytes_accessed),
    )(x, w, b)


# --------------------------- AdaptiveSoftmax module --------------------------

class AdaptiveSoftmaxPallas:
    def __init__(self, input_size, cutoffs, scale_down=4, init=0.1, seed=0):
        self.input_size = int(input_size)
        self.cutoffs = list(cutoffs)
        self.output_size = cutoffs[0] + len(cutoffs) - 1
        self.n_clusters = len(cutoffs) - 1
        self.cluster_sizes = [cutoffs[i + 1] - cutoffs[i]
                              for i in range(self.n_clusters)]
        self.hid = max(input_size // scale_down, 1)

        # padded, lane-dense dims (multiples of 256 when > 128)
        self.d_pad = _pad_dim(input_size)
        self.o_pad = _pad_dim(self.output_size)
        self.hid_pad = _pad_dim(self.hid)
        self.c_pads = [_pad_dim(c) for c in self.cluster_sizes]

        key = jax.random.PRNGKey(seed)
        keys = jax.random.split(key, 2 + 2 * max(self.n_clusters, 1))
        k_hw, k_hb, k_tail = keys[0], keys[1], keys[2:]

        # head: weight ~ U(-init, init) (like reset()), bias ~ nn.Linear default
        hw = jax.random.uniform(k_hw, (input_size, self.output_size),
                                jnp.float32, -init, init)
        bound = 1.0 / math.sqrt(input_size)
        hb = jax.random.uniform(k_hb, (self.output_size,), jnp.float32, -bound, bound)
        self.head_w = (jnp.zeros((self.d_pad, self.o_pad), jnp.bfloat16)
                       .at[:input_size, :self.output_size]
                       .set(hw.astype(jnp.bfloat16)))
        self.head_b = (jnp.zeros((1, self.o_pad), jnp.float32)
                       .at[0, :self.output_size].set(hb))

        # tails: two bias-free Linears each, zero-padded, bf16 operands
        self.tail_w1, self.tail_w2, self.tail_b2 = [], [], []
        self.zero_bias_h = jnp.zeros((1, self.hid_pad), jnp.float32)
        for i in range(self.n_clusters):
            csize = self.cluster_sizes[i]
            w1 = jax.random.uniform(k_tail[2 * i], (input_size, self.hid),
                                    jnp.float32, -init, init)
            w2 = jax.random.uniform(k_tail[2 * i + 1], (self.hid, csize),
                                    jnp.float32, -init, init)
            self.tail_w1.append(jnp.zeros((self.d_pad, self.hid_pad), jnp.bfloat16)
                                .at[:input_size, :self.hid].set(w1.astype(jnp.bfloat16)))
            self.tail_w2.append(jnp.zeros((self.hid_pad, self.c_pads[i]), jnp.bfloat16)
                                .at[:self.hid, :csize].set(w2.astype(jnp.bfloat16)))
            self.tail_b2.append(jnp.zeros((1, self.c_pads[i]), jnp.float32))

        self.id = []

    def set_target(self, target):
        target = np.asarray(target)
        self.id = []
        for i in range(self.n_clusters):
            mask = (target >= self.cutoffs[i]) & (target < self.cutoffs[i + 1])
            self.id.append(np.nonzero(mask)[0].astype(np.int32)
                           if mask.sum() > 0 else None)

    def forward(self, inp):
        assert inp.ndim == 2
        n, d = inp.shape
        assert d == self.input_size
        n_pad, tm = _batch_tiling(n)

        # pad + cast once; zero padding keeps matmul results exact
        x_pad = (jnp.zeros((n_pad, self.d_pad), jnp.bfloat16)
                 .at[:n, :d].set(jnp.asarray(inp, jnp.bfloat16)))

        tk_d = _pick_tile(self.d_pad)
        head_full = linear(x_pad, self.head_w, self.head_b,
                           tm=tm, tn=_pick_tile(self.o_pad), tk=tk_d)
        # TODO(synk): optionally emit bf16 logits (halves writeback) behind a flag.
        output = [head_full[:n, :self.output_size]]

        # Tail: compact the Ni selected rows per cluster BEFORE the kernels run,
        # so tail FLOPs / HBM traffic scale with sum(Ni), not n_clusters * N.
        # TODO(synk): the host-side row gather could move in-kernel via a grouped
        # matmul (scalar-prefetched per-cluster row offsets driving the lhs index_map).
        thid = _pick_tile(self.hid_pad)
        for i in range(len(self.id)):
            idx = self.id[i]
            if idx is None:
                output.append(None)
                continue
            ni = int(idx.shape[0])
            ni_pad, tm_c = _batch_tiling(ni)
            sel = jnp.take(x_pad, jnp.asarray(idx), axis=0)          # (ni, d_pad) bf16
            x_c = jnp.zeros((ni_pad, self.d_pad), jnp.bfloat16).at[:ni].set(sel)

            # layer 1: h = x_c @ W1 (bf16 operands, f32 accumulation, D tiled by tk_d)
            h = linear(x_c, self.tail_w1[i], self.zero_bias_h,
                       tm=tm_c, tn=thid, tk=tk_d)
            h_b = h.astype(jnp.bfloat16)                              # MXU operand rounding
            # layer 2: y = h @ W2 (hidden reduction tiled by thid)
            y = linear(h_b, self.tail_w2[i], self.tail_b2[i],
                       tm=tm_c, tn=_pick_tile(self.c_pads[i]), tk=thid)
            output.append(y[:ni, :self.cluster_sizes[i]])
        return output


# ----------------------------------- driver ---------------------------------

if __name__ == "__main__":
    input_size = 32
    cutoffs = [10, 18, 30]          # output_size = 10 + 2 = 12
    batch = 8

    key = jax.random.PRNGKey(0)
    k_x, k_t = jax.random.split(key)
    x = jax.random.normal(k_x, (batch, input_size), jnp.float32)
    target = np.asarray(jax.random.randint(k_t, (batch,), 0, cutoffs[-1], jnp.int32))

    model = AdaptiveSoftmaxPallas(input_size, cutoffs, scale_down=4, seed=0)
    model.set_target(target)
    out = model.forward(x)
    for o in out:
        if o is not None:
            jax.block_until_ready(o)

    # reference check (same bf16 operand rounding, f32 accumulation)
    x_b = jnp.asarray(x, jnp.bfloat16).astype(jnp.float32)
    hw = model.head_w[:input_size, :model.output_size].astype(jnp.float32)
    hb = model.head_b[0, :model.output_size]
    ref_head = x_b @ hw + hb
    assert np.allclose(np.asarray(out[0]), np.asarray(ref_head), atol=1e-2, rtol=1e-2)

    for i, idx in enumerate(model.id):
        if idx is None:
            assert out[i + 1] is None
            continue
        csize = model.cluster_sizes[i]
        w1 = model.tail_w1[i][:input_size, :model.hid].astype(jnp.float32)
        w2 = model.tail_w2[i][:model.hid, :csize].astype(jnp.float32)
        h = (x_b[idx] @ w1).astype(jnp.bfloat16).astype(jnp.float32)
        ref_tail = h @ w2
        assert np.allclose(np.asarray(out[i + 1]), np.asarray(ref_tail),
                           atol=1e-2, rtol=1e-2)

    print("KERNEL_OK")
</pallas_src>

<mosaic_0001>
module attributes {stable_mosaic.version = 11 : i64} {
  func.func @_linear_kernel(%arg0: i32, %arg1: i32, %arg2: i32, %arg3: memref<16x128xbf16, #tpu.memory_space<vmem>>, %arg4: memref<128x128xbf16, #tpu.memory_space<vmem>>, %arg5: memref<1x128xf32, #tpu.memory_space<vmem>>, %arg6: memref<16x128xf32, #tpu.memory_space<vmem>>) attributes {dimension_semantics = [#tpu.dimension_semantics<parallel>, #tpu.dimension_semantics<parallel>, #tpu.dimension_semantics<arbitrary>], iteration_bounds = array<i64: 1, 1, 1>, scalar_prefetch = 0 : i64, scratch_operands = 0 : i64, tpu.core_type = #tpu.core_type<tc>, window_params = [{transform_indices = @transform_0, window_bounds = array<i64: 16, 128>}, {transform_indices = @transform_1, window_bounds = array<i64: 128, 128>}, {transform_indices = @transform_2, window_bounds = array<i64: 1, 128>}, {transform_indices = @transform_3, window_bounds = array<i64: 16, 128>}]} {
    %c0_i32 = arith.constant 0 : i32
    %0 = arith.cmpi eq, %arg2, %c0_i32 : i32
    %1 = arith.extui %0 : i1 to i32
    %c0_i32_0 = arith.constant 0 : i32
    %2 = arith.cmpi ne, %1, %c0_i32_0 : i32
    scf.if %2 {
      %c0_8 = arith.constant 0 : index
      %c0_9 = arith.constant 0 : index
      %9 = vector.load %arg5[%c0_8, %c0_9] : memref<1x128xf32, #tpu.memory_space<vmem>>, vector<1x128xf32>
      %10 = vector.shape_cast %9 : vector<1x128xf32> to vector<1x128xf32>
      %11 = vector.broadcast %10 : vector<1x128xf32> to vector<16x128xf32>
      %c0_10 = arith.constant 0 : index
      %c0_11 = arith.constant 0 : index
      %12 = vector.load %arg6[%c0_10, %c0_11] : memref<16x128xf32, #tpu.memory_space<vmem>>, vector<16x128xf32>
      tpu.vector_store %arg6[%c0_10, %c0_11], %11 {strides = array<i32>} : memref<16x128xf32, #tpu.memory_space<vmem>>, vector<16x128xf32>,
    } else {
    }
    %c0 = arith.constant 0 : index
    %c0_1 = arith.constant 0 : index
    %3 = vector.load %arg6[%c0, %c0_1] : memref<16x128xf32, #tpu.memory_space<vmem>>, vector<16x128xf32>
    %c0_2 = arith.constant 0 : index
    %c0_3 = arith.constant 0 : index
    %4 = vector.load %arg3[%c0_2, %c0_3] : memref<16x128xbf16, #tpu.memory_space<vmem>>, vector<16x128xbf16>
    %c0_4 = arith.constant 0 : index
    %c0_5 = arith.constant 0 : index
    %5 = vector.load %arg4[%c0_4, %c0_5] : memref<128x128xbf16, #tpu.memory_space<vmem>>, vector<128x128xbf16>
    %cst = arith.constant dense<0.000000e+00> : vector<16x128xf32>
    %6 = tpu.matmul %4, %5, %cst {dimension_numbers = #tpu.dot_dimension_numbers<[1], [0], [0], [1], [0, 0, 1, 1], [], []>} : vector<16x128xbf16>, vector<128x128xbf16>, vector<16x128xf32> -> vector<16x128xf32>
    %7 = arith.addf %3, %6 : vector<16x128xf32>
    %c0_6 = arith.constant 0 : index
    %c0_7 = arith.constant 0 : index
    %8 = vector.load %arg6[%c0_6, %c0_7] : memref<16x128xf32, #tpu.memory_space<vmem>>, vector<16x128xf32>
    tpu.vector_store %arg6[%c0_6, %c0_7], %7 {strides = array<i32>} : memref<16x128xf32, #tpu.memory_space<vmem>>, vector<16x128xf32>,
    return
  }
  func.func @transform_0(%arg0: i32, %arg1: i32, %arg2: i32) -> (i32, i32) {
    %c0_i32 = arith.constant 0 : i32
    return %arg0, %arg2 : i32, i32
  }
  func.func @transform_1(%arg0: i32, %arg1: i32, %arg2: i32) -> (i32, i32) {
    %c0_i32 = arith.constant 0 : i32
    return %arg2, %arg1 : i32, i32
  }
  func.func @transform_2(%arg0: i32, %arg1: i32, %arg2: i32) -> (i32, i32) {
    %c0_i32 = arith.constant 0 : i32
    %c0_i32_0 = arith.constant 0 : i32
    return %c0_i32, %arg1 : i32, i32
  }
  func.func @transform_3(%arg0: i32, %arg1: i32, %arg2: i32) -> (i32, i32) {
    %c0_i32 = arith.constant 0 : i32
    return %arg0, %arg1 : i32, i32
  }
}

</mosaic_0001>

<bundles_post_ra>
// kernel: tpu_custom_call.1
= control target key start
LH: loop header
LB: loop body
LE: loop exit
PB: predicated region body
PF: predicated region fallthrough
CT: control target
= control target key end

     0   :  { %8 = vsyncpa [#allocation3], 0  ;;  %s339_s0 = inlined_call_operand.hbm [shape: bf16[16,128], index: 0, kind: input, shape index: {}]   ;;  %s340_s1 = inlined_call_operand.hbm [shape: bf16[128,128], index: 1, kind: input, shape index: {}]   ;;  %s341_s2 = inlined_call_operand.vmem [shape: f32[1,128], index: 2, kind: input, shape index: {}]   ;;  %s342_s3 = inlined_call_operand.hbm [shape: f32[16,128], index: 3, kind: output, shape index: {}]  }
   0x1   :  { %9 = vsyncpa [#allocation6], 0 }
   0x2   :  { %10 = vsyncpa [#allocation4], 0  ;;  %s15_s14 = sshll.u32 %s339_s0, 4  ;;  %s300_s15 = smov [#allocation2]   ;;  %s16_s14 = int_to_ptr.hbm [resolvable:$true] %s15_s14 }
   0x3   :  { %s17_s16 = sshll.u32 %s300_s15, 4  ;;  %s28_s19 = sshll.u32 %s340_s1, 4  ;;  %s18_s16 = int_to_ptr.vmem [resolvable:$true] %s17_s16  ;;  %s29_s19 = int_to_ptr.hbm [resolvable:$true] %s28_s19 }
   0x4   :  { %s301_s20 = smov 64   ;;  %s302_s21 = smov 4  }
   0x5   :  { %23 = dma.hbm_to_vmem [thread:$0]  %s16_s14, 128, %s18_s16, [#allocation3], %s301_s20, %s301_s20, %s302_s21  }
   0x6   :  { %s303_s22 = smov [#allocation5]  }
   0x7   :  { %s30_s23 = sshll.u32 %s303_s22, 4  ;;  %s31_s23 = int_to_ptr.vmem [resolvable:$true] %s30_s23 }
   0x8   :  { %36 = dma.hbm_to_vmem [thread:$0]  %s29_s19, 1024, %s31_s23, [#allocation6], %s301_s20, %s301_s20, %s302_s21  }
   0x9   :  { %294 = dma.done.wait [#allocation3], 128  }
   0xa   :  { %295 = vsyncadd [#allocation3], 4294967168 }
   0xb   :  { %296 = dma.done.wait [#allocation6], 1024  }
   0xc   :  { %297 = vsyncadd [#allocation6], 4294966272  ;;  %v213_v0 = vld [vmem:[#allocation5 + $0x38] sm:$0xff]  ;;  %v212_v1 = vld [vmem:[#allocation5 + $0x30] sm:$0xff]  ;;  %s304_s24 = smov [#allocation7]   ;;  %s155_s28 = sshll.u32 %s342_s3, 4  ;;  %s156_s28 = int_to_ptr.hbm [resolvable:$true] %s155_s28 }
   0xd   :  { %131 = vmatpush.bf16.msra.mxu0 %v213_v0  ;;  %v211_v2 = vld [vmem:[#allocation5 + $0x28] sm:$0xff]  ;;  %v210_v3 = vld [vmem:[#allocation5 + $0x20] sm:$0xff]  ;;  %v209_v4 = vld [vmem:[#allocation5 + $0x18] sm:$0xff]  ;;  %s153_s25 = sshll.u32 %s304_s24, 4  ;;  %s305_s29 = smov 128   ;;  %s154_s25 = int_to_ptr.vmem [resolvable:$true] %s153_s25 }
   0xe   :  { %v208_v5 = vld [vmem:[#allocation5 + $0x10] sm:$0xff]  ;;  %v207_v6 = vld [vmem:[#allocation5 + $0x8] sm:$0xff]  ;;  %v206_v7 = vld [vmem:[#allocation5] sm:$0xff]  ;;  %s306_s30 = smov 8  }
   0xf   :  { %v205_v8 = vld [vmem:[#allocation2] sm:$0xff] }
  0x10   :  { %v221_v9 = vld [vmem:[%s341_s2] ss:$0 sm:$0xff] }
  0x11   :  { %132 = vmatpush.bf16.msra.mxu0 %v212_v1 }
  0x15   :  { %133 = vmatpush.bf16.msra.mxu0 %v211_v2 }
  0x19   :  { %134 = vmatpush.bf16.msra.mxu0 %v210_v3 }
  0x1d   :  { %135 = vmatpush.bf16.msra.mxu0 %v209_v4 }
  0x21   :  { %136 = vmatpush.bf16.msra.mxu0 %v208_v5 }
  0x25   :  { %137 = vmatpush.bf16.msra.mxu0 %v207_v6 }
  0x29   :  { %138 = vmatpush.bf16.msra.mxu0 %v206_v7 }
  0x2c   :  { %139 = vmatmul.bf16.vlgmr.msra.gmra.mxu0 %v205_v8 }
  0xa9   :  { %v140_v10 = vpop.f32.mrf.mxu0 }
  0xaa   :  { %v145_v11 = vadd.f32 %v221_v9, %v140_v10 }
  0xac   :  { %147 = vst [vmem:[#allocation7] sm:$0xff] %v145_v11 }
  0xb1   :  { %v142_v12 = vpop.f32.mrf.mxu0 }
  0xb2   :  { %v146_v13 = vadd.f32 %v221_v9, %v142_v12 }
  0xb4   :  { %148 = vst [vmem:[#allocation7 + $0x8] sm:$0xff] %v146_v13 }
  0xb5   :  { %161 = dma.vmem_to_hbm [thread:$0]  %s154_s25, 256, %s156_s28, [#allocation4], %s305_s29, %s305_s29, %s306_s30  }
  0xb6   :  { %298 = dma.done.wait [#allocation4], 256  }
  0xb7   :  { %299 = vsyncadd [#allocation4], 4294967040 }
  0xb8   :  { %166 = vsyncpa [#allocation3], 1 }
  0xb9   :  { %167 = vsyncpa [#allocation6], 1 }
  0xba   :  { %168 = vsyncpa [#allocation4], 1 }

</bundles_post_ra>
